<compile_context>
chip_gen: v6e
topology: v6e:2x2x1
jax: 0.10.0
libtpu: 0.0.40
codegen_flags: <defaults>
</compile_context>

<pallas_src>
import functools

import jax
import jax.numpy as jnp
from jax import lax
from jax.experimental import pallas as pl
from jax.experimental.pallas import tpu as pltpu


def _conv_bn_relu_kernel(p_ref, w_ref, scale_ref, shift_ref, o_ref, acc_ref):
    # p_ref:     (1, 1, tk, tm)     bf16 patch tile (K-major, M on lanes)
    # w_ref:     (1, coutp, tk)     bf16 weight tile (natural PyTorch flatten)
    # scale_ref: (1, coutp, 1)      f32 BN scale  (gamma / sqrt(var + eps))
    # shift_ref: (1, coutp, 1)      f32 BN shift  (beta - mean * scale)
    # o_ref:     (1, 1, coutp, tm)  output tile (lane-dense)
    # acc_ref:   (coutp, tm)        f32 accumulator scratch
    kk = pl.program_id(3)

    @pl.when(kk == 0)
    def _init():
        acc_ref[...] = jnp.zeros_like(acc_ref)

    acc_ref[...] += jnp.dot(w_ref[0], p_ref[0, 0],
                            preferred_element_type=jnp.float32)

    @pl.when(kk == pl.num_programs(3) - 1)
    def _finalize():
        # f32 epilogue on the f32 accumulator; only the final store casts.
        y = acc_ref[...] * scale_ref[0] + shift_ref[0]
        o_ref[0, 0] = jnp.maximum(y, 0.0).astype(o_ref.dtype)


def _round_up(x, m):
    return ((x + m - 1) // m) * m


def _pick_tiles():
    """Per-generation (tm, tk) targets; actual tiles are clamped to the problem."""
    try:
        kind = jax.devices()[0].device_kind.lower()
    except Exception:  # pragma: no cover - defensive
        kind = ""
    if "v5" in kind and ("lite" in kind or "5e" in kind):
        return 256, 512   # v5e: 128-wide MXU, smaller default VMEM budget
    if "v6" in kind:
        return 512, 512   # v6e: fill the 256-wide MXU, 128 MiB VMEM
    if "v7" in kind or "7x" in kind:
        return 512, 512   # v7x: blocks stay far below the 64 MiB VMEM budget
    return 256, 512


def conv_block_forward(x, weight, gamma, beta, running_mean, running_var,
                       *, stride=1, padding=0, groups=1, eps=1e-5,
                       compute_dtype=jnp.bfloat16):
    """Fused Conv2d(bias=False) + BatchNorm2d(eval) + ReLU.

    x:      (N, Cin, H, W)            NCHW
    weight: (Cout, Cin//groups, k, k) PyTorch OIHW
    returns (N, Cout, OH, OW)         NCHW
    """
    n, cin, h, w = x.shape
    cout, cin_g, k, _ = weight.shape
    g = groups
    assert cin_g * g == cin and cout % g == 0
    coutg = cout // g
    oh = (h + 2 * padding - k) // stride + 1
    ow = (w + 2 * padding - k) // stride + 1
    m_img = oh * ow
    kg = cin_g * k * k

    # BatchNorm (eval mode) folded into per-channel scale/shift (kept f32).
    scale = (gamma / jnp.sqrt(running_var + eps)).astype(jnp.float32)
    shift = (beta - running_mean * scale).astype(jnp.float32)

    # ---- K-major im2col straight from NCHW (no NHWC transpose, bf16). ----
    xp = jnp.pad(x.astype(compute_dtype),
                 ((0, 0), (0, 0), (padding, padding), (padding, padding)))
    cols = []
    for i in range(k):
        for j in range(k):
            cols.append(xp[:, :, i:i + stride * oh:stride,
                            j:j + stride * ow:stride])        # (N, Cin, OH, OW)
    # (N, Cin, k*k, OH, OW): per-group K order = (c, kh, kw), which is exactly
    # PyTorch's weight.reshape(coutg, cin_g*k*k) flatten order.  All reshapes
    # below are contiguous (free).
    patches = jnp.stack(cols, axis=2).reshape(n, g, kg, m_img)

    # ---- Tiling / padding (lane dim = M, sublane dim = Cout_g). ----
    tm_t, tk_t = _pick_tiles()
    tm = min(tm_t, _round_up(m_img, 128))
    m_pad = _round_up(m_img, tm)
    if kg <= tk_t:
        tk, k_pad = kg, kg                      # single K step, no K padding
    else:
        tk, k_pad = tk_t, _round_up(kg, tk_t)   # K-tiled reduction
    coutp = _round_up(coutg, 8)

    if (k_pad, m_pad) != (kg, m_img):
        patches = jnp.pad(
            patches, ((0, 0), (0, 0), (0, k_pad - kg), (0, m_pad - m_img)))

    w_mat = weight.reshape(g, coutg, kg).astype(compute_dtype)
    if (coutp, k_pad) != (coutg, kg):
        w_mat = jnp.pad(w_mat, ((0, 0), (0, coutp - coutg), (0, k_pad - kg)))
    sc = jnp.pad(scale.reshape(g, coutg, 1), ((0, 0), (0, coutp - coutg), (0, 0)))
    sh = jnp.pad(shift.reshape(g, coutg, 1), ((0, 0), (0, coutp - coutg), (0, 0)))

    grid = (n, g, m_pad // tm, k_pad // tk)
    out_bytes = n * g * coutp * m_pad * jnp.dtype(x.dtype).itemsize
    cost = pl.CostEstimate(
        flops=2 * n * g * m_pad * coutp * k_pad,
        transcendentals=0,
        bytes_accessed=int(patches.size * patches.dtype.itemsize
                           + w_mat.size * w_mat.dtype.itemsize
                           + sc.size * 4 + sh.size * 4 + out_bytes),
    )

    out_flat = pl.pallas_call(
        _conv_bn_relu_kernel,
        out_shape=jax.ShapeDtypeStruct((n, g, coutp, m_pad), x.dtype),
        grid_spec=pltpu.PrefetchScalarGridSpec(
            num_scalar_prefetch=0,
            grid=grid,
            in_specs=[
                pl.BlockSpec((1, 1, tk, tm), lambda b, gi, mi, ki: (b, gi, ki, mi)),
                pl.BlockSpec((1, coutp, tk), lambda b, gi, mi, ki: (gi, 0, ki)),
                pl.BlockSpec((1, coutp, 1), lambda b, gi, mi, ki: (gi, 0, 0)),
                pl.BlockSpec((1, coutp, 1), lambda b, gi, mi, ki: (gi, 0, 0)),
            ],
            out_specs=pl.BlockSpec((1, 1, coutp, tm),
                                   lambda b, gi, mi, ki: (b, gi, 0, mi)),
            scratch_shapes=[pltpu.VMEM((coutp, tm), jnp.float32)],
        ),
        compiler_params=pltpu.CompilerParams(
            dimension_semantics=("parallel", "parallel", "parallel", "arbitrary"),
            vmem_limit_bytes=64 * 1024 * 1024,
        ),
        cost_estimate=cost,
    )(patches, w_mat, sc, sh)

    # (N, G, coutp, Mpad) -> (N, Cout, OH, OW).  For aligned shapes the slice is
    # a no-op and the reshape is free: no output transpose, no concatenate.
    # NOTE: padded M columns / padded Cout rows hold relu(shift)/0 garbage and
    # must be sliced away (they are, here).
    return out_flat[:, :, :coutg, :m_img].reshape(n, cout, oh, ow)


def _reference(x, weight, gamma, beta, running_mean, running_var,
               *, stride, padding, groups, eps=1e-5):
    conv = lax.conv_general_dilated(
        x, weight, window_strides=(stride, stride),
        padding=[(padding, padding), (padding, padding)],
        dimension_numbers=("NCHW", "OIHW", "NCHW"),
        feature_group_count=groups)
    scale = (gamma / jnp.sqrt(running_var + eps)).reshape(1, -1, 1, 1)
    shift = beta.reshape(1, -1, 1, 1) - running_mean.reshape(1, -1, 1, 1) * scale
    return jnp.maximum(conv * scale + shift, 0.0)


if __name__ == "__main__":
    def _run_case(n, cin, cout, h, w, k, stride, pad, groups, seed):
        key = jax.random.PRNGKey(seed)
        kx, kw_, kg_, kb, km, kv = jax.random.split(key, 6)
        x = jax.random.normal(kx, (n, cin, h, w), dtype=jnp.float32)
        weight = 0.1 * jax.random.normal(
            kw_, (cout, cin // groups, k, k), dtype=jnp.float32)
        # Round x / weight to bf16-representable values so the bf16 MXU path
        # produces exact products and matches the f32 reference tightly.
        x = x.astype(jnp.bfloat16).astype(jnp.float32)
        weight = weight.astype(jnp.bfloat16).astype(jnp.float32)
        gamma = 1.0 + 0.1 * jax.random.normal(kg_, (cout,), dtype=jnp.float32)
        beta = 0.1 * jax.random.normal(kb, (cout,), dtype=jnp.float32)
        rmean = 0.05 * jax.random.normal(km, (cout,), dtype=jnp.float32)
        rvar = 1.0 + 0.1 * jax.random.uniform(kv, (cout,), dtype=jnp.float32)

        fwd = jax.jit(functools.partial(
            conv_block_forward, stride=stride, padding=pad, groups=groups))
        out = jax.block_until_ready(fwd(x, weight, gamma, beta, rmean, rvar))
        ref = _reference(x, weight, gamma, beta, rmean, rvar,
                         stride=stride, padding=pad, groups=groups)
        oh = (h + 2 * pad - k) // stride + 1
        ow = (w + 2 * pad - k) // stride + 1
        assert out.shape == (n, cout, oh, ow), out.shape
        err = float(jnp.max(jnp.abs(out - ref)))
        assert jnp.allclose(out, ref, atol=1e-3, rtol=1e-3), err

    # ConvBlock(in_channels=4, out_channels=8, kernel_size=3, stride=1, padding=1)
    _run_case(n=2, cin=4, cout=8, h=16, w=16, k=3, stride=1, pad=1, groups=1, seed=0)
    # grouped + strided variant (exercises the M / Cout padding paths)
    _run_case(n=2, cin=4, cout=8, h=16, w=16, k=3, stride=2, pad=1, groups=2, seed=1)

    print("KERNEL_OK")
</pallas_src>

<mosaic_0001>
module attributes {stable_mosaic.version = 11 : i64} {
  func.func @_conv_bn_relu_kernel(%arg0: i32, %arg1: i32, %arg2: i32, %arg3: i32, %arg4: memref<1x1x36x256xbf16, #tpu.memory_space<vmem>>, %arg5: memref<1x8x36xbf16, #tpu.memory_space<vmem>>, %arg6: memref<1x8x1xf32, #tpu.memory_space<vmem>>, %arg7: memref<1x8x1xf32, #tpu.memory_space<vmem>>, %arg8: memref<1x1x8x256xf32, #tpu.memory_space<vmem>>, %arg9: memref<8x256xf32, #tpu.memory_space<vmem>>) attributes {dimension_semantics = [#tpu.dimension_semantics<parallel>, #tpu.dimension_semantics<parallel>, #tpu.dimension_semantics<parallel>, #tpu.dimension_semantics<arbitrary>], iteration_bounds = array<i64: 2, 1, 1, 1>, scalar_prefetch = 0 : i64, scratch_operands = 1 : i64, tpu.core_type = #tpu.core_type<tc>, window_params = [{transform_indices = @transform_0, window_bounds = array<i64: 1, 1, 36, 256>}, {transform_indices = @transform_1, window_bounds = array<i64: 1, 8, 36>}, {transform_indices = @transform_2, window_bounds = array<i64: 1, 8, 1>}, {transform_indices = @transform_3, window_bounds = array<i64: 1, 8, 1>}, {transform_indices = @transform_4, window_bounds = array<i64: 1, 1, 8, 256>}]} {
    %c0_i32 = arith.constant 0 : i32
    %0 = arith.cmpi eq, %arg3, %c0_i32 : i32
    %1 = arith.extui %0 : i1 to i32
    %c0_i32_0 = arith.constant 0 : i32
    %2 = arith.cmpi ne, %1, %c0_i32_0 : i32
    scf.if %2 {
      %cst_13 = arith.constant 0.000000e+00 : f32
      %14 = vector.broadcast %cst_13 : f32 to vector<8x256xf32>
      %c0_14 = arith.constant 0 : index
      %c0_15 = arith.constant 0 : index
      %15 = vector.load %arg9[%c0_14, %c0_15] : memref<8x256xf32, #tpu.memory_space<vmem>>, vector<8x256xf32>
      tpu.vector_store %arg9[%c0_14, %c0_15], %14 {strides = array<i32>} : memref<8x256xf32, #tpu.memory_space<vmem>>, vector<8x256xf32>,
    } else {
    }
    %c0 = arith.constant 0 : index
    %c0_1 = arith.constant 0 : index
    %3 = vector.load %arg9[%c0, %c0_1] : memref<8x256xf32, #tpu.memory_space<vmem>>, vector<8x256xf32>
    %c0_2 = arith.constant 0 : index
    %c0_3 = arith.constant 0 : index
    %c0_4 = arith.constant 0 : index
    %4 = vector.load %arg5[%c0_2, %c0_3, %c0_4] : memref<1x8x36xbf16, #tpu.memory_space<vmem>>, vector<1x8x36xbf16>
    %5 = vector.shape_cast %4 : vector<1x8x36xbf16> to vector<8x36xbf16>
    %c0_5 = arith.constant 0 : index
    %c0_6 = arith.constant 0 : index
    %c0_7 = arith.constant 0 : index
    %c0_8 = arith.constant 0 : index
    %6 = vector.load %arg4[%c0_5, %c0_6, %c0_7, %c0_8] : memref<1x1x36x256xbf16, #tpu.memory_space<vmem>>, vector<1x1x36x256xbf16>
    %7 = vector.shape_cast %6 : vector<1x1x36x256xbf16> to vector<36x256xbf16>
    %cst = arith.constant dense<0.000000e+00> : vector<8x256xf32>
    %8 = tpu.matmul %5, %7, %cst {dimension_numbers = #tpu.dot_dimension_numbers<[1], [0], [0], [1], [0, 0, 1, 1], [], []>} : vector<8x36xbf16>, vector<36x256xbf16>, vector<8x256xf32> -> vector<8x256xf32>
    %9 = arith.addf %3, %8 : vector<8x256xf32>
    %c0_9 = arith.constant 0 : index
    %c0_10 = arith.constant 0 : index
    %10 = vector.load %arg9[%c0_9, %c0_10] : memref<8x256xf32, #tpu.memory_space<vmem>>, vector<8x256xf32>
    tpu.vector_store %arg9[%c0_9, %c0_10], %9 {strides = array<i32>} : memref<8x256xf32, #tpu.memory_space<vmem>>, vector<8x256xf32>,
    %c0_i32_11 = arith.constant 0 : i32
    %11 = arith.cmpi eq, %arg3, %c0_i32_11 : i32
    %12 = arith.extui %11 : i1 to i32
    %c0_i32_12 = arith.constant 0 : i32
    %13 = arith.cmpi ne, %12, %c0_i32_12 : i32
    scf.if %13 {
      %c0_13 = arith.constant 0 : index
      %c0_14 = arith.constant 0 : index
      %14 = vector.load %arg9[%c0_13, %c0_14] : memref<8x256xf32, #tpu.memory_space<vmem>>, vector<8x256xf32>
      %c0_15 = arith.constant 0 : index
      %c0_16 = arith.constant 0 : index
      %c0_17 = arith.constant 0 : index
      %15 = vector.load %arg6[%c0_15, %c0_16, %c0_17] : memref<1x8x1xf32, #tpu.memory_space<vmem>>, vector<1x8x1xf32>
      %16 = vector.shape_cast %15 : vector<1x8x1xf32> to vector<8x1xf32>
      %17 = vector.broadcast %16 : vector<8x1xf32> to vector<8x256xf32>
      %18 = arith.mulf %14, %17 : vector<8x256xf32>
      %c0_18 = arith.constant 0 : index
      %c0_19 = arith.constant 0 : index
      %c0_20 = arith.constant 0 : index
      %19 = vector.load %arg7[%c0_18, %c0_19, %c0_20] : memref<1x8x1xf32, #tpu.memory_space<vmem>>, vector<1x8x1xf32>
      %20 = vector.shape_cast %19 : vector<1x8x1xf32> to vector<8x1xf32>
      %21 = vector.broadcast %20 : vector<8x1xf32> to vector<8x256xf32>
      %22 = arith.addf %18, %21 : vector<8x256xf32>
      %cst_21 = arith.constant 0.000000e+00 : f32
      %23 = vector.broadcast %cst_21 : f32 to vector<8x256xf32>
      %24 = arith.maximumf %22, %23 : vector<8x256xf32>
      %c0_22 = arith.constant 0 : index
      %c0_23 = arith.constant 0 : index
      %c0_24 = arith.constant 0 : index
      %c0_25 = arith.constant 0 : index
      %25 = vector.load %arg8[%c0_22, %c0_23, %c0_24, %c0_25] : memref<1x1x8x256xf32, #tpu.memory_space<vmem>>, vector<1x1x8x256xf32>
      %26 = vector.shape_cast %25 : vector<1x1x8x256xf32> to vector<8x256xf32>
      %27 = vector.shape_cast %24 : vector<8x256xf32> to vector<1x1x8x256xf32>
      tpu.vector_store %arg8[%c0_22, %c0_23, %c0_24, %c0_25], %27 {strides = array<i32>} : memref<1x1x8x256xf32, #tpu.memory_space<vmem>>, vector<1x1x8x256xf32>,
    } else {
    }
    return
  }
  func.func @transform_0(%arg0: i32, %arg1: i32, %arg2: i32, %arg3: i32) -> (i32, i32, i32, i32) {
    %c0_i32 = arith.constant 0 : i32
    return %arg0, %arg1, %arg3, %arg2 : i32, i32, i32, i32
  }
  func.func @transform_1(%arg0: i32, %arg1: i32, %arg2: i32, %arg3: i32) -> (i32, i32, i32) {
    %c0_i32 = arith.constant 0 : i32
    %c0_i32_0 = arith.constant 0 : i32
    return %arg1, %c0_i32, %arg3 : i32, i32, i32
  }
  func.func @transform_2(%arg0: i32, %arg1: i32, %arg2: i32, %arg3: i32) -> (i32, i32, i32) {
    %c0_i32 = arith.constant 0 : i32
    %c0_i32_0 = arith.constant 0 : i32
    %c0_i32_1 = arith.constant 0 : i32
    return %arg1, %c0_i32, %c0_i32_0 : i32, i32, i32
  }
  func.func @transform_3(%arg0: i32, %arg1: i32, %arg2: i32, %arg3: i32) -> (i32, i32, i32) {
    %c0_i32 = arith.constant 0 : i32
    %c0_i32_0 = arith.constant 0 : i32
    %c0_i32_1 = arith.constant 0 : i32
    return %arg1, %c0_i32, %c0_i32_0 : i32, i32, i32
  }
  func.func @transform_4(%arg0: i32, %arg1: i32, %arg2: i32, %arg3: i32) -> (i32, i32, i32, i32) {
    %c0_i32 = arith.constant 0 : i32
    %c0_i32_0 = arith.constant 0 : i32
    return %arg0, %arg1, %c0_i32, %arg2 : i32, i32, i32, i32
  }
}

</mosaic_0001>

<bundles_post_ra>
// kernel: conv_block_forward.1
= control target key start
LH: loop header
LB: loop body
LE: loop exit
PB: predicated region body
PF: predicated region fallthrough
CT: control target
= control target key end

     0   :  { %s753_s15 = smov 0   ;;  %s755_s16 = smov 0   ;;  %s799_s0 = inlined_call_operand.vmem [shape: bf16[2,1,36,256], index: 0, kind: input, shape index: {}]   ;;  %s800_s1 = inlined_call_operand.vmem [shape: bf16[1,8,36], index: 1, kind: input, shape index: {}]   ;;  %s801_s2 = inlined_call_operand.vmem [shape: f32[1,8,1], index: 2, kind: input, shape index: {}]   ;;  %s802_s3 = inlined_call_operand.vmem [shape: f32[1,8,1], index: 3, kind: input, shape index: {}]   ;;  %s803_s4 = inlined_call_operand.vmem [shape: f32[2,1,8,256], index: 4, kind: output, shape index: {}]  }
   0x1   :  { %s757_s17 = smov 0  }
   0x2 LB: > { %s40_s18 = sadd.s32 1, %s721_s16  ;;  %p653_p0 = scmp.ge.s32.totalorder %s725_s17, 1  ;;  %s725_s17 = sphi %s757_s17, %s14_s17   ;;  %s721_s16 = sphi %s755_s16, %s805_s16   ;;  %s717_s15 = sphi %s753_s15, %s804_s15  }
   0x3   : > { %p42_p1 = scmp.ge.s32.totalorder %s40_s18, 2  ;;  %p245_p2 = scmp.lt.s32.totalorder %s725_s17, 3 }
   0x5   : > { %s807_s18 = smov (%p42_p1, %s40_s18), 0  ;;  %p246_p3 = pnand %p653_p0, %p245_p2 }
   0x6   : > { %p309_p4 = scmp.lt.s32.totalorder (!%p246_p3), %s717_s15, 1 }
   0x7   : > { %249 = sbr.rel (%p246_p3) target bundleno = 233 (0xe9), region = 36 }
   0xc   : > { %v727_v0 = vmov 0   ;;  %v457_v1 = vld [vmem:[%s801_s2] sm:$0xff]  ;;  %s809_s15 = smov (!%p309_p4, %s717_s15), 1  ;;  %vm400_vm0 = vcmask 1041408   ;;  %vm396_vm1 = vcmask 293888  }
   0xd   : > { %439 = vmatprep.mubr.bf16.mxu0 %v727_v0  ;;  %694 = vset.pattern.permute.xlu0 %v727_v0  ;;  %v465_v2 = vld [vmem:[%s802_s3] sm:$0xff]  ;;  %s668_s23 = smul.u32 40, %s809_s15  ;;  %s667_s29 = sshll.u32 %s809_s15, 4 }
   0xe   : > { %460 = vperm.xlu0 %694, %v457_v1   ;;  %v365_v11 = vld [vmem:[%s800_s1] sm:$0xf]  ;;  %s354_s6 = scalar_lea.vmem %s803_s4, %s667_s29 }
   0xf   : > { %s324_s26 = scalar_lea.vmem %s799_s0, %s668_s23 }
  0x10   : > { %v370_v3 = vld [vmem:[%s324_s26 + $0x20] sm:$0x33]  ;;  %v697_v6 = vld [vmem:[%s324_s26 + $0x14] ss:$8 sps:$4 sm:$0xff]   ;;  %v699_v8 = vld [vmem:[%s324_s26 + $0x10] ss:$8 sps:$4 sm:$0xff]  }
  0x11   : > { %v662_v4 = vcombine.high %v370_v3, %v370_v3  ;;  %v661_v5 = vcombine.low %v370_v3, %v370_v3  ;;  %v700_v9 = vld [vmem:[%s324_s26 + $0x4] ss:$8 sps:$4 sm:$0xff]   ;;  %v702_v10 = vld [vmem:[%s324_s26] ss:$8 sps:$4 sm:$0xff]  }
  0x12   : > { %468 = vperm.xlu0 %694, %v465_v2  }
  0x13   : > { %663 = vmatprep.subr.msk.bf16.mxu0 %vm400_vm0, %v662_v4  ;;  %v402_v7 = vsel %vm400_vm0, %v661_v5, 0 }
  0x14   : > { %418 = vmatpush1.bf16.msra.mxu0 %v402_v7 }
  0x15   : > { %419 = vmatprep.subr.bf16.mxu0 %v697_v6 }
  0x18   : > { %420 = vmatpush1.bf16.msra.mxu0 %v699_v8 }
  0x19   : > { %421 = vmatprep.subr.bf16.mxu0 %v700_v9 }
  0x1c   : > { %422 = vmatpush1.bf16.msra.mxu0 %v702_v10 }
  0x1f   : > { %664 = vmatmul.mubr.msk.bf16.vlgmr.msra.gmra.mxu0 %vm396_vm1, %v365_v11 }
  0x89   : > { %v461_v12 = vpop.permute.xlu0 %460 }
  0x8d   : > { %v469_v15 = vpop.permute.xlu0 %468 }
  0xdf   : > { %v441_v13 = vpop.f32.mrf.mxu0 }
  0xe0   : > { %v463_v14 = vmul.f32 %v461_v12, %v441_v13 }
  0xe1   : > { %v443_v16 = vpop.f32.mrf.mxu0 }
  0xe2   : > { %v471_v17 = vadd.f32 %v469_v15, %v463_v14  ;;  %v464_v18 = vmul.f32 %v461_v12, %v443_v16 }
  0xe3   : > { %v445_v19 = vpop.f32.mrf.mxu0 }
  0xe4   : > { %v473_v20 = vmax.f32 %v471_v17, 0.0  ;;  %v472_v21 = vadd.f32 %v469_v15, %v464_v18 }
  0xe5   : > { %v446_v22 = vpop.f32.mrf.mxu0 }
  0xe6   : > { %475 = vst [vmem:[%s354_s6] sm:$0xff] %v473_v20  ;;  %v474_v23 = vmax.f32 %v472_v21, 0.0 }
  0xe8   : > { %476 = vst [vmem:[%s354_s6 + $0x8] sm:$0xff] %v474_v23 }
  0xe9 PF: > { %s14_s17 = sadd.s32 1, %s725_s17   ;;  %s804_s15 = smov %s721_s16 }
  0xea   : > { %p11_p5 = scmp.ge.s32.totalorder %s14_s17, 4   ;;  %s805_s16 = smov %s807_s18 }
  0xec   :  { %13 = sbr.rel (!%p11_p5) target bundleno = 2 (0x2), region = 83 }

</bundles_post_ra>
